<compile_context>
chip_gen: v7x
topology: tpu7x:2x2x1
jax: 0.10.0
libtpu: 0.0.40
codegen_flags: <defaults>
</compile_context>

<pallas_src>
import functools
import math

import jax
import jax.numpy as jnp
import numpy as np
from jax.experimental import pallas as pl
from jax.experimental.pallas import tpu as pltpu

# Mirrors the PyTorch module's op tables (odd kernels only; '4x4' has no
# padding entry in the reference PADDING_OPS either).
KERNEL_SIZE_OPS = {'1x1': 1, '3x3': 3, '5x5': 5, '7x7': 7}
PADDING_OPS = {'1x1': 0, '3x3': 1, '5x5': 2, '7x7': 3}


def _round_up(x, m):
    return (x + m - 1) // m * m


# ---------------------------------------------------------------------------
# Pallas kernel: in-VMEM im2col -> one deep matmul -> fused activation
# ---------------------------------------------------------------------------
def _sss_conv_kernel(x_ref, w_ref, o_ref, xcol_ref, *, K, Wp, C_in, P, act):
    """x_ref:    (1, C_in, Lflat)      bf16  channel-major, spatially padded,
                                             width-flattened activation
       w_ref:    (Cout_pad, K*K*C_in)  bf16  tap-major, split-replicated weights
       o_ref:    (1, Cout_pad, P)      f32   transposed output, column q = h*Wp+w
       xcol_ref: (K*K*C_in, P)         bf16  in-VMEM im2col scratch
    """
    # In-VMEM im2col: K*K statically shifted copies stacked along sublanes.
    # (Each shifted slice is consumed exactly once, so the lane rotation is
    # fused into a copy that has to happen anyway.)
    for t in range(K * K):
        kh, kw = divmod(t, K)
        off = kh * Wp + kw                                   # static flat shift
        xcol_ref[t * C_in:(t + 1) * C_in, :] = x_ref[0, :, off:off + P]

    # One deep matmul: contraction over K*K*C_in, f32 accumulation on the MXU.
    acc = jnp.dot(w_ref[...], xcol_ref[...],
                  preferred_element_type=jnp.float32)

    if act == 'ReLU':
        acc = jnp.maximum(acc, 0.0)
    elif act == 'LeakyReLU':
        acc = jnp.where(acc >= 0.0, acc, 0.2 * acc)
    # act == 'none': identity
    o_ref[0] = acc


# ---------------------------------------------------------------------------
# Wrapper (layout glue only; all heavy work runs in the kernel)
# ---------------------------------------------------------------------------
def split_stack_sum(x, weight, *, kernel_size, act_op, split=4):
    """x: (N, C_in, H, W) f32 NCHW.  weight: (C_out, C_in//split, K, K) f32."""
    K = KERNEL_SIZE_OPS[kernel_size]
    pad = PADDING_OPS[kernel_size]
    N, C_in, H, W = x.shape
    C_out = weight.shape[0]
    assert C_in % split == 0, "C_in must be divisible by split"
    chunk = C_in // split
    assert weight.shape == (C_out, chunk, K, K)

    Hp, Wp = H + 2 * pad, W + 2 * pad
    Lspat = Hp * Wp
    P = _round_up(H * Wp, 128)               # matmul output width (lane dim)
    max_off = (K - 1) * Wp + (K - 1)         # largest static tap shift
    Lflat = _round_up(max(Lspat, max_off + P), 128)
    Cout_pad = _round_up(C_out, 8)           # sublane padding only (f32 tile)
    KKC = K * K * C_in

    # Activation: NCHW is already channel-major -> no transpose needed.
    xs = x.astype(jnp.bfloat16)
    xs = jnp.pad(xs, ((0, 0), (0, 0), (pad, pad), (pad, pad)))
    xs = xs.reshape(N, C_in, Lspat)
    xs = jnp.pad(xs, ((0, 0), (0, 0), (0, Lflat - Lspat)))

    # Weights: fold split-sum into the contraction by tiling along C_in, then
    # lay columns out tap-major (kh, kw, c) to match the im2col row order.
    w_full = jnp.tile(weight, (1, split, 1, 1))              # (C_out, C_in, K, K)
    w_mat = jnp.transpose(w_full, (0, 2, 3, 1)).reshape(C_out, KKC)
    w_mat = jnp.pad(w_mat, ((0, Cout_pad - C_out), (0, 0))).astype(jnp.bfloat16)

    # VMEM budget from tile-padded shapes (bf16 sublane tile 16, f32 tile 8,
    # lanes already multiples of 128), x2 for Pallas double buffering;
    # capped below v7x's 64 MiB physical VMEM for compiler headroom.
    x_blk = _round_up(C_in, 16) * Lflat * 2 * 2
    w_blk = _round_up(Cout_pad, 16) * _round_up(KKC, 128) * 2 * 2
    col_blk = _round_up(KKC, 16) * P * 2
    o_blk = Cout_pad * P * 4 * 2
    need = x_blk + w_blk + col_blk + o_blk
    vmem_limit = int(min(max(2 * need + (8 << 20), 32 << 20), 48 << 20))

    kernel = functools.partial(_sss_conv_kernel, K=K, Wp=Wp, C_in=C_in, P=P,
                               act=act_op)
    out = pl.pallas_call(
        kernel,
        out_shape=jax.ShapeDtypeStruct((N, Cout_pad, P), jnp.float32),
        grid=(N,),
        in_specs=[
            pl.BlockSpec((1, C_in, Lflat), lambda n: (n, 0, 0)),
            # Constant index map -> weight block stays resident across steps.
            pl.BlockSpec((Cout_pad, KKC), lambda n: (0, 0)),
        ],
        out_specs=pl.BlockSpec((1, Cout_pad, P), lambda n: (n, 0, 0)),
        scratch_shapes=[pltpu.VMEM((KKC, P), jnp.bfloat16)],
        compiler_params=pltpu.CompilerParams(
            dimension_semantics=("parallel",),
            vmem_limit_bytes=vmem_limit),
    )(xs, w_mat)

    # Strip Cout sublane padding, rows beyond H*Wp, and the Wp>W garbage
    # columns; result is already NCHW.
    out = out[:, :C_out, :H * Wp].reshape(N, C_out, H, Wp)[:, :, :, :W]
    return out


def init_split_stack_sum(key, C_in, C_out, kernel_size, split=4):
    """PyTorch Conv2d default init: U(-1/sqrt(fan_in), 1/sqrt(fan_in))."""
    K = KERNEL_SIZE_OPS[kernel_size]
    chunk = C_in // split
    bound = 1.0 / math.sqrt(chunk * K * K)
    return jax.random.uniform(key, (C_out, chunk, K, K), jnp.float32,
                              -bound, bound)


# Pure-JAX reference (f32) for validation.
def split_stack_sum_reference(x, weight, *, kernel_size, act_op, split=4):
    K = KERNEL_SIZE_OPS[kernel_size]
    pad = PADDING_OPS[kernel_size]
    N, C_in, H, W = x.shape
    chunk = C_in // split
    xs = x.reshape(N, split, chunk, H, W).sum(axis=1)
    out = jax.lax.conv_general_dilated(
        xs, weight, window_strides=(1, 1),
        padding=[(pad, pad), (pad, pad)],
        dimension_numbers=('NCHW', 'OIHW', 'NCHW'),
        precision=jax.lax.Precision.HIGHEST)
    if act_op == 'ReLU':
        out = jnp.maximum(out, 0.0)
    elif act_op == 'LeakyReLU':
        out = jnp.where(out >= 0.0, out, 0.2 * out)
    return out


if __name__ == "__main__":
    key = jax.random.PRNGKey(0)
    kx, kw1, kw2 = jax.random.split(key, 3)

    N, C_in, H, W = 2, 16, 16, 16
    x = jax.random.normal(kx, (N, C_in, H, W), jnp.float32)

    # Config 1: 3x3 conv + ReLU (common NAS-DIP choice), split=4, C_out=8.
    w1 = init_split_stack_sum(kw1, C_in, 8, '3x3', split=4)
    y1 = jax.block_until_ready(
        split_stack_sum(x, w1, kernel_size='3x3', act_op='ReLU', split=4))
    r1 = split_stack_sum_reference(x, w1, kernel_size='3x3', act_op='ReLU',
                                   split=4)
    assert y1.shape == (N, 8, H, W), y1.shape
    assert bool(jnp.all(jnp.isfinite(y1)))
    np.testing.assert_allclose(np.asarray(y1), np.asarray(r1),
                               rtol=0.1, atol=0.1)

    # Config 2: 1x1 conv + LeakyReLU(0.2), C_out=16.
    w2 = init_split_stack_sum(kw2, C_in, 16, '1x1', split=4)
    y2 = jax.block_until_ready(
        split_stack_sum(x, w2, kernel_size='1x1', act_op='LeakyReLU', split=4))
    r2 = split_stack_sum_reference(x, w2, kernel_size='1x1',
                                   act_op='LeakyReLU', split=4)
    assert y2.shape == (N, 16, H, W), y2.shape
    np.testing.assert_allclose(np.asarray(y2), np.asarray(r2),
                               rtol=0.1, atol=0.1)

    print("KERNEL_OK")
</pallas_src>

<mosaic_0001>
module attributes {stable_mosaic.version = 11 : i64} {
  func.func @_sss_conv_kernel(%arg0: i32, %arg1: memref<1x16x512xbf16, #tpu.memory_space<vmem>>, %arg2: memref<8x144xbf16, #tpu.memory_space<vmem>>, %arg3: memref<1x8x384xf32, #tpu.memory_space<vmem>>, %arg4: memref<144x384xbf16, #tpu.memory_space<vmem>>) attributes {dimension_semantics = [#tpu.dimension_semantics<parallel>], iteration_bounds = array<i64: 2>, scalar_prefetch = 0 : i64, scratch_operands = 1 : i64, tpu.core_type = #tpu.core_type<tc>, window_params = [{transform_indices = @transform_0, window_bounds = array<i64: 1, 16, 512>}, {pipeline_mode = #tpu.pipeline_mode<synchronous>, transform_indices = @transform_1, window_bounds = array<i64: 8, 144>}, {transform_indices = @transform_2, window_bounds = array<i64: 1, 8, 384>}]} {
    %c0 = arith.constant 0 : index
    %c0_0 = arith.constant 0 : index
    %c0_1 = arith.constant 0 : index
    %0 = vector.load %arg1[%c0, %c0_0, %c0_1] : memref<1x16x512xbf16, #tpu.memory_space<vmem>>, vector<1x16x384xbf16>
    %1 = vector.shape_cast %0 : vector<1x16x384xbf16> to vector<16x384xbf16>
    %c0_2 = arith.constant 0 : index
    %c0_3 = arith.constant 0 : index
    %2 = vector.load %arg4[%c0_2, %c0_3] : memref<144x384xbf16, #tpu.memory_space<vmem>>, vector<16x384xbf16>
    tpu.vector_store %arg4[%c0_2, %c0_3], %1 {strides = array<i32>} : memref<144x384xbf16, #tpu.memory_space<vmem>>, vector<16x384xbf16>,
    %c0_4 = arith.constant 0 : index
    %c0_5 = arith.constant 0 : index
    %c1 = arith.constant 1 : index
    %3 = vector.load %arg1[%c0_4, %c0_5, %c1] : memref<1x16x512xbf16, #tpu.memory_space<vmem>>, vector<1x16x384xbf16>
    %4 = vector.shape_cast %3 : vector<1x16x384xbf16> to vector<16x384xbf16>
    %c16 = arith.constant 16 : index
    %c0_6 = arith.constant 0 : index
    %5 = vector.load %arg4[%c16, %c0_6] : memref<144x384xbf16, #tpu.memory_space<vmem>>, vector<16x384xbf16>
    tpu.vector_store %arg4[%c16, %c0_6], %4 {strides = array<i32>} : memref<144x384xbf16, #tpu.memory_space<vmem>>, vector<16x384xbf16>,
    %c0_7 = arith.constant 0 : index
    %c0_8 = arith.constant 0 : index
    %c2 = arith.constant 2 : index
    %6 = vector.load %arg1[%c0_7, %c0_8, %c2] : memref<1x16x512xbf16, #tpu.memory_space<vmem>>, vector<1x16x384xbf16>
    %7 = vector.shape_cast %6 : vector<1x16x384xbf16> to vector<16x384xbf16>
    %c32 = arith.constant 32 : index
    %c0_9 = arith.constant 0 : index
    %8 = vector.load %arg4[%c32, %c0_9] : memref<144x384xbf16, #tpu.memory_space<vmem>>, vector<16x384xbf16>
    tpu.vector_store %arg4[%c32, %c0_9], %7 {strides = array<i32>} : memref<144x384xbf16, #tpu.memory_space<vmem>>, vector<16x384xbf16>,
    %c0_10 = arith.constant 0 : index
    %c0_11 = arith.constant 0 : index
    %c18 = arith.constant 18 : index
    %9 = vector.load %arg1[%c0_10, %c0_11, %c18] : memref<1x16x512xbf16, #tpu.memory_space<vmem>>, vector<1x16x384xbf16>
    %10 = vector.shape_cast %9 : vector<1x16x384xbf16> to vector<16x384xbf16>
    %c48 = arith.constant 48 : index
    %c0_12 = arith.constant 0 : index
    %11 = vector.load %arg4[%c48, %c0_12] : memref<144x384xbf16, #tpu.memory_space<vmem>>, vector<16x384xbf16>
    tpu.vector_store %arg4[%c48, %c0_12], %10 {strides = array<i32>} : memref<144x384xbf16, #tpu.memory_space<vmem>>, vector<16x384xbf16>,
    %c0_13 = arith.constant 0 : index
    %c0_14 = arith.constant 0 : index
    %c19 = arith.constant 19 : index
    %12 = vector.load %arg1[%c0_13, %c0_14, %c19] : memref<1x16x512xbf16, #tpu.memory_space<vmem>>, vector<1x16x384xbf16>
    %13 = vector.shape_cast %12 : vector<1x16x384xbf16> to vector<16x384xbf16>
    %c64 = arith.constant 64 : index
    %c0_15 = arith.constant 0 : index
    %14 = vector.load %arg4[%c64, %c0_15] : memref<144x384xbf16, #tpu.memory_space<vmem>>, vector<16x384xbf16>
    tpu.vector_store %arg4[%c64, %c0_15], %13 {strides = array<i32>} : memref<144x384xbf16, #tpu.memory_space<vmem>>, vector<16x384xbf16>,
    %c0_16 = arith.constant 0 : index
    %c0_17 = arith.constant 0 : index
    %c20 = arith.constant 20 : index
    %15 = vector.load %arg1[%c0_16, %c0_17, %c20] : memref<1x16x512xbf16, #tpu.memory_space<vmem>>, vector<1x16x384xbf16>
    %16 = vector.shape_cast %15 : vector<1x16x384xbf16> to vector<16x384xbf16>
    %c80 = arith.constant 80 : index
    %c0_18 = arith.constant 0 : index
    %17 = vector.load %arg4[%c80, %c0_18] : memref<144x384xbf16, #tpu.memory_space<vmem>>, vector<16x384xbf16>
    tpu.vector_store %arg4[%c80, %c0_18], %16 {strides = array<i32>} : memref<144x384xbf16, #tpu.memory_space<vmem>>, vector<16x384xbf16>,
    %c0_19 = arith.constant 0 : index
    %c0_20 = arith.constant 0 : index
    %c36 = arith.constant 36 : index
    %18 = vector.load %arg1[%c0_19, %c0_20, %c36] : memref<1x16x512xbf16, #tpu.memory_space<vmem>>, vector<1x16x384xbf16>
    %19 = vector.shape_cast %18 : vector<1x16x384xbf16> to vector<16x384xbf16>
    %c96 = arith.constant 96 : index
    %c0_21 = arith.constant 0 : index
    %20 = vector.load %arg4[%c96, %c0_21] : memref<144x384xbf16, #tpu.memory_space<vmem>>, vector<16x384xbf16>
    tpu.vector_store %arg4[%c96, %c0_21], %19 {strides = array<i32>} : memref<144x384xbf16, #tpu.memory_space<vmem>>, vector<16x384xbf16>,
    %c0_22 = arith.constant 0 : index
    %c0_23 = arith.constant 0 : index
    %c37 = arith.constant 37 : index
    %21 = vector.load %arg1[%c0_22, %c0_23, %c37] : memref<1x16x512xbf16, #tpu.memory_space<vmem>>, vector<1x16x384xbf16>
    %22 = vector.shape_cast %21 : vector<1x16x384xbf16> to vector<16x384xbf16>
    %c112 = arith.constant 112 : index
    %c0_24 = arith.constant 0 : index
    %23 = vector.load %arg4[%c112, %c0_24] : memref<144x384xbf16, #tpu.memory_space<vmem>>, vector<16x384xbf16>
    tpu.vector_store %arg4[%c112, %c0_24], %22 {strides = array<i32>} : memref<144x384xbf16, #tpu.memory_space<vmem>>, vector<16x384xbf16>,
    %c0_25 = arith.constant 0 : index
    %c0_26 = arith.constant 0 : index
    %c38 = arith.constant 38 : index
    %24 = vector.load %arg1[%c0_25, %c0_26, %c38] : memref<1x16x512xbf16, #tpu.memory_space<vmem>>, vector<1x16x384xbf16>
    %25 = vector.shape_cast %24 : vector<1x16x384xbf16> to vector<16x384xbf16>
    %c128 = arith.constant 128 : index
    %c0_27 = arith.constant 0 : index
    %26 = vector.load %arg4[%c128, %c0_27] : memref<144x384xbf16, #tpu.memory_space<vmem>>, vector<16x384xbf16>
    tpu.vector_store %arg4[%c128, %c0_27], %25 {strides = array<i32>} : memref<144x384xbf16, #tpu.memory_space<vmem>>, vector<16x384xbf16>,
    %c0_28 = arith.constant 0 : index
    %c0_29 = arith.constant 0 : index
    %27 = vector.load %arg2[%c0_28, %c0_29] : memref<8x144xbf16, #tpu.memory_space<vmem>>, vector<8x144xbf16>
    %c0_30 = arith.constant 0 : index
    %c0_31 = arith.constant 0 : index
    %28 = vector.load %arg4[%c0_30, %c0_31] : memref<144x384xbf16, #tpu.memory_space<vmem>>, vector<144x384xbf16>
    %cst = arith.constant dense<0.000000e+00> : vector<8x384xf32>
    %29 = tpu.matmul %27, %28, %cst {dimension_numbers = #tpu.dot_dimension_numbers<[1], [0], [0], [1], [0, 0, 1, 1], [], []>} : vector<8x144xbf16>, vector<144x384xbf16>, vector<8x384xf32> -> vector<8x384xf32>
    %cst_32 = arith.constant 0.000000e+00 : f32
    %30 = vector.broadcast %cst_32 : f32 to vector<8x384xf32>
    %31 = arith.maximumf %29, %30 : vector<8x384xf32>
    %c0_33 = arith.constant 0 : index
    %c0_34 = arith.constant 0 : index
    %c0_35 = arith.constant 0 : index
    %32 = vector.load %arg3[%c0_33, %c0_34, %c0_35] : memref<1x8x384xf32, #tpu.memory_space<vmem>>, vector<1x8x384xf32>
    %33 = vector.shape_cast %32 : vector<1x8x384xf32> to vector<8x384xf32>
    %34 = vector.shape_cast %31 : vector<8x384xf32> to vector<1x8x384xf32>
    tpu.vector_store %arg3[%c0_33, %c0_34, %c0_35], %34 {strides = array<i32>} : memref<1x8x384xf32, #tpu.memory_space<vmem>>, vector<1x8x384xf32>,
    return
  }
  func.func @transform_0(%arg0: i32) -> (i32, i32, i32) {
    %c0_i32 = arith.constant 0 : i32
    %c0_i32_0 = arith.constant 0 : i32
    %c0_i32_1 = arith.constant 0 : i32
    return %arg0, %c0_i32, %c0_i32_0 : i32, i32, i32
  }
  func.func @transform_1(%arg0: i32) -> (i32, i32) {
    %c0_i32 = arith.constant 0 : i32
    %c0_i32_0 = arith.constant 0 : i32
    %c0_i32_1 = arith.constant 0 : i32
    return %c0_i32, %c0_i32_0 : i32, i32
  }
  func.func @transform_2(%arg0: i32) -> (i32, i32, i32) {
    %c0_i32 = arith.constant 0 : i32
    %c0_i32_0 = arith.constant 0 : i32
    %c0_i32_1 = arith.constant 0 : i32
    return %arg0, %c0_i32, %c0_i32_0 : i32, i32, i32
  }
}

</mosaic_0001>

<bundles_post_ra>
// kernel: tpu_custom_call.1
= control target key start
LH: loop header
LB: loop body
LE: loop exit
PB: predicated region body
PF: predicated region fallthrough
CT: control target
= control target key end

     0   :  { %7 = vsyncpa [#allocation4], 0  ;;  %s1226_s0 = inlined_call_operand.hbm [shape: bf16[2,16,512], index: 0, kind: input, shape index: {}]   ;;  %s1227_s1 = inlined_call_operand.hbm [shape: bf16[8,144], index: 1, kind: input, shape index: {}]   ;;  %s1228_s2 = inlined_call_operand.hbm [shape: f32[2,8,384], index: 2, kind: output, shape index: {}]  }
   0x1   :  { %9 = vsyncpa [#allocation4 + $0x1], 0 }
   0x2   :  { %10 = vsyncpa [#allocation7], 0 }
   0x3   :  { %11 = vsyncpa [#allocation5], 0 }
   0x4   :  { %13 = vsyncpa [#allocation5 + $0x1], 0  ;;  %s1014_s9 = smov 0   ;;  %s1016_s10 = smov 0  }
   0x5   :  { %s1018_s11 = smov 0   ;;  %s1020_s12 = smov 0  }
   0x6 LB: > { %s1035_s13 = sadd.s32 4294967295, %s983_s12   ;;  %s723_s14 = sadd.s32 4294967294, %s983_s12   ;;  %s983_s12 = sphi %s1020_s12, %s1253_s12   ;;  %s979_s11 = sphi %s1018_s11, %s1252_s11   ;;  %s975_s10 = sphi %s1016_s10, %s1251_s10   ;;  %s971_s9 = sphi %s1014_s9, %s1250_s9  }
   0x7   : > { %s1039_s15 = sadd.s32 1, %s983_s12   ;;  %s26_s16 = sadd.s32 1, %s979_s11 }
   0x8   : > { %s23_s17 = ssub.s32 %s983_s12, %s1039_s15  ;;  %p33_p0 = scmp.ne.s32.totalorder %s979_s11, %s975_s10 }
   0x9   : > { %p24_p1 = scmp.eq.s32.totalorder %s23_s17, 0  ;;  %p34_p2 = scmp.eq.s32.totalorder %s983_s12, 0 }
   0xa   : > { %p39_p3 = scmp.ne.s32.totalorder %s975_s10, %s971_s9  ;;  %p1229_p4 = scmp.eq.s32.totalorder %s1035_s13, 0 }
   0xb   : > { %s1051_s18 = scalar_select %p24_p1, %s979_s11, %s26_s16  }
   0xc   : > { %p1053_p5 = por %p34_p2, %p33_p0  ;;  %p1059_p6 = por %p1229_p4, %p39_p3 }
   0xd   : > { %p84_p7 = scmp.eq.s32.totalorder %s1035_s13, 1  ;;  %p90_p8 = scmp.eq.s32.totalorder %s723_s14, 1 }
   0xe   : > { %s1235_s20 = scalar_select %p1059_p6, 1, 0 }
   0xf   : > { %p724_p9 = scmp.ge.s32.totalorder %s983_s12, 1  ;;  %p97_p10 = scmp.lt.s32.totalorder %s983_s12, 3 }
  0x10   : > { %p1066_p11 = por %p84_p7, %p33_p0  ;;  %p1070_p12 = por %p90_p8, %p39_p3 }
  0x11   : > { %p1074_p13 = pnand %p724_p9, %p97_p10  ;;  %s985_s24 = smov [#allocation6]  }
  0x12   : > { %s1236_s21 = scalar_select %p1066_p11, 1, 0 }
  0x13   : > { %s1237_s22 = scalar_select %p1070_p12, 1, 0 }
  0x14   : > { %s1238_s23 = scalar_select %p1074_p13, 1, 0 }
  0x15   : > { %p786_p2 = pneg %p1074_p13  ;;  %s110_s25 = sshll.u32 %s985_s24, 4  ;;  %s111_s25 = int_to_ptr.vmem [resolvable:$true] %s110_s25 }
  0x16   : > { %p799_p4 = scmp.lt.s32.totalorder %s983_s12, 2  ;;  %p1239_p0 = scmp.eq.s32.totalorder %s1035_s13, 0 }
  0x17   : > { %s121_s27 = sand.u32 1, %s979_s11   ;;  %s855_s4 = scalar_lea.hbm %s1227_s1, 128 }
  0x18   : > { %p1084_p7 = pnand %p786_p2, %p1239_p0  ;;  %p1091_p3 = pnand %p799_p4, %p1053_p5 }
  0x19   : > { %s727_s29 = sshll.u32 %s121_s27, 5  ;;  %p856_p8 = scmp.ne.s32.totalorder %s1227_s1, %s855_s4 }
  0x1a   : > { %s1241_s28 = scalar_select %p1091_p3, 1, 0 }
  0x1b   : > { %p857_p9 = pneg %p1084_p7  ;;  %p862_p4 = scmp.lt.u32.totalorder %s855_s4, %s1227_s1 }
  0x1d   : > { %p858_p10 = pnand %p857_p9, %p856_p8 }
  0x1f   : > { %p859_p2 = pneg %p858_p10 }
  0x21   : > { %p864_p5 = pnand %p862_p4, %p859_p2 }
  0x23   : > { %867 = shalt.err (!%p864_p5)
}
  0x24   : > { %s868_s14 = scalar_lea.vmem %s111_s25, 128  ;;  %p876_p11 = scmp.lt.s32.totalorder %s111_s25, %s111_s25 }
  0x25   : > { %p869_p0 = scmp.ne.s32.totalorder %s111_s25, %s868_s14  ;;  %p877_p6 = scmp.lt.s32.totalorder %s868_s14, %s868_s14 }
  0x27   : > { %p871_p1 = pnand %p869_p0, %p857_p9  ;;  %p878_p13 = por %p877_p6, %p876_p11 }
  0x29   : > { %p872_p12 = pneg %p871_p1 }
  0x2b   : > { %p879_p3 = pnand %p878_p13, %p872_p12 }
  0x2d   : > { %882 = shalt.err (!%p879_p3)
}
  0x2e   : > { %789 = dma.hbm_to_vmem [thread:$0]  (!%p1084_p7), %s1227_s1, 128, %s111_s25, [#allocation7]  }
  0x2f   : > { %s775_s19 = sshll.u32 %s983_s12, 9  ;;  %s125_s24 = scalar_lea.vmem [#allocation3], %s727_s29 }
  0x30   : > { %s132_s30 = sshll.u32 %s125_s24, 4  ;;  %s1115_s5 = scalar_lea.hbm %s1226_s0, %s775_s19  ;;  %s1117_s30 = int_to_ptr.vmem [resolvable:$true] %s132_s30 }
  0x31   : > { %s1119_s26 = scalar_lea.sflag [#allocation4], %s121_s27  ;;  %s883_s6 = scalar_lea.hbm %s1115_s5, 512 }
  0x32   : > { %p884_p6 = scmp.ne.s32.totalorder %s1115_s5, %s883_s6  ;;  %p1242_p11 = scmp.ne.s32.totalorder %s1241_s28, 0 }
  0x33   : > { %s888_s7 = scalar_lea.hbm %s1226_s0, 1024  ;;  %p889_p7 = scmp.lt.u32.totalorder %s1115_s5, %s1226_s0 }
  0x34   : > { %p885_p12 = pneg %p1242_p11  ;;  %p890_p3 = scmp.lt.u32.totalorder %s888_s7, %s883_s6 }
  0x35   : > { %p892_p9 = scmp.lt.u32.totalorder %s883_s6, %s1115_s5 }
  0x36   : > { %p886_p13 = pnand %p885_p12, %p884_p6  ;;  %p891_p8 = por %p890_p3, %p889_p7 }
  0x38   : > { %p887_p1 = pneg %p886_p13  ;;  %p893_p10 = por %p892_p9, %p891_p8 }
  0x3a   : > { %p894_p2 = pnand %p893_p10, %p887_p1 }
  0x3c   : > { %897 = shalt.err (!%p894_p2)
}
  0x3d   : > { %s898_s27 = scalar_lea.vmem %s1117_s30, 512  ;;  %s986_s16 = smov [#allocation3]  }
  0x3e   : > { %p899_p4 = scmp.ne.s32.totalorder %s1117_s30, %s898_s27  ;;  %s903_s17 = sshll.u32 %s986_s16, 4  ;;  %s904_s17 = int_to_ptr.vmem [resolvable:$false] %s903_s17 }
  0x3f   : > { %s905_s19 = scalar_lea.vmem %s904_s17, 1024  ;;  %p906_p6 = scmp.lt.s32.totalorder %s1117_s30, %s904_s17 }
  0x40   : > { %p901_p5 = pnand %p899_p4, %p885_p12  ;;  %p907_p13 = scmp.lt.s32.totalorder %s905_s19, %s898_s27 }
  0x42   : > { %p902_p0 = pneg %p901_p5  ;;  %p908_p7 = por %p907_p13, %p906_p6 }
  0x44   : > { %p909_p3 = pnand %p908_p7, %p902_p0 }
  0x46   : > { %912 = shalt.err (!%p909_p3)
}
  0x47   : > { %s987_s24 = smov 256   ;;  %s988_s3 = smov 16  }
  0x48   : > { %793 = dma.hbm_to_vmem [thread:$0]  (!%p1242_p11), %s1115_s5, 512, %s1117_s30, %s1119_s26, %s987_s24, %s987_s24, %s988_s3  }
  0x49   : > { %p1243_p12 = scmp.ne.s32.totalorder %s1238_s23, 0 }
  0x4a   : > { %s1150_s4 = sand.u32 (!%p1243_p12), 1, %s975_s10   ;;  %p1244_p1 = scmp.ne.s32.totalorder (!%p1243_p12), %s1235_s20, 0 }
  0x4b   : > { %144 = sbr.rel (%p1243_p12) target bundleno = 495 (0x1ef), region = 28  ;;  %s731_s6 = sshll.u32 (!%p1243_p12), %s1150_s4, 5 }
  0x4c   : > { %s147_s25 = scalar_lea.sflag (!%p1243_p12), [#allocation4], %s1150_s4  ;;  %s150_s29 = scalar_lea.vmem (!%p1243_p12), [#allocation3], %s731_s6 }
  0x52   : > { %958 = dma.done.wait (%p1244_p1), %s147_s25, 512  }
  0x53   : > { %960 = vsyncadd (%p1244_p1), %s147_s25, 4294966784  ;;  %p1245_p8 = scmp.eq.s32.totalorder %s1035_s13, 0 }
  0x55   : > { %962 = dma.done.wait (%p1245_p8), [#allocation7], 128   ;;  %p1246_p11 = pmov %p1245_p8 }
  0x56   : > { %v989_v0 = vmov 0   ;;  %v846_v1 = vld [vmem:[%s150_s29 + $0x4] ss:$16 sps:$4 sm:$0xff]   ;;  %v848_v2 = vld [vmem:[%s150_s29] ss:$16 sps:$4 sm:$0xff]   ;;  %s990_s23 = smov 127  }
  0x57   : > { %964 = vsyncadd (%p1246_p11), [#allocation7], 4294967168  ;;  %582 = vmatprep.subr.bf16.mxu1 %v989_v0  ;;  %221 = vrot.lane.b32.xlu0 %v846_v1, %s990_s23  ;;  %v849_v3 = vld [vmem:[%s150_s29 + $0x8] ss:$16 sps:$4 sm:$0xff]   ;;  %v851_v4 = vld [vmem:[%s150_s29 + $0xc] ss:$16 sps:$4 sm:$0xff]  }
  0x58   : > { %541 = vmatprep.subr.bf16.mxu0 %v846_v1  ;;  %219 = vrot.lane.b32.xlu1 %v848_v2, %s990_s23  ;;  %v852_v5 = vld [vmem:[%s150_s29 + $0x8] ss:$16 sps:$4 sm:$0xff]   ;;  %s991_s20 = smov 126   ;;  %s992_s28 = smov 110   ;;  %v1164_v6 = vld [vmem:[#allocation6] sm:$0xff]  ;;  %vm537_vm0 = vcmask 130048  }
  0x59   : > { %542 = vmatpush1.bf16.msra.mxu0 %v848_v2  ;;  %583 = vmatpush1.bf16.msra.mxu1 %v852_v5  ;;  %s993_s30 = smov 109   ;;  %s994_s5 = smov 108   ;;  %v769_v7 = vcombine.high %v1164_v6, %v1164_v6  ;;  %vm227_vm1 = vcmask 1039360   ;;  %vm265_vm2 = vcmask 1031168   ;;  %vm303_vm3 = vcmask 900096  }
  0x5a   : > { %584 = vmatprep.subr.bf16.mxu1 %v989_v0  ;;  %s995_s26 = smov 92   ;;  %s996_s7 = smov 91   ;;  %vm341_vm4 = vcmask 891904   ;;  %vm379_vm5 = vcmask 883712   ;;  %vm417_vm6 = vcmask 752640   ;;  %vm455_vm7 = vcmask 744448  }
  0x5b   : > { %223 = vrot.lane.b32.xlu0 %v849_v3, %s990_s23  ;;  %770 = vmatprep.mubr.msk.bf16.mxu0 %vm537_vm0, %v769_v7  ;;  %s997_s8 = smov 90   ;;  %vm493_vm8 = vcmask 736256   ;;  %v768_v63 = vcombine.low %v1164_v6, %v1164_v6  ;;  %s776_s14 = smul.u32 24, %s1150_s4 }
  0x5c   : > { %225 = vrot.lane.b32.xlu1 %v851_v4, %s990_s23  ;;  %771 = vmatprep.mubr.msk.bf16.mxu1 %vm537_vm0, %v769_v7  ;;  %s777_s27 = smul.u32 384, %s1035_s13  ;;  %s629_s13 = scalar_lea.sflag [#allocation5], %s1150_s4 }
  0x5d   : > { %s174_s16 = scalar_lea.vmem [#allocation8], %s776_s14  ;;  %p1247_p10 = scmp.ne.s32.totalorder %s1236_s21, 0 }
  0x5e   : > { %s643_s17 = sshll.u32 %s174_s16, 4  ;;  %s1182_s3 = scalar_lea.hbm %s1228_s2, %s777_s27  ;;  %s1184_s17 = int_to_ptr.vmem [resolvable:$true] %s643_s17 }
  0x5f   : > { %259 = vrot.lane.b32.xlu0 %v846_v1, %s991_s20  ;;  %s913_s6 = scalar_lea.vmem %s1184_s17, 384  ;;  %s998_s25 = smov [#allocation8]  }
  0x60   : > { %261 = vrot.lane.b32.xlu1 %v849_v3, %s991_s20  ;;  %p914_p9 = scmp.ne.s32.totalorder %s1184_s17, %s913_s6  ;;  %s917_s29 = sshll.u32 %s998_s25, 4  ;;  %s918_s29 = int_to_ptr.vmem [resolvable:$false] %s917_s29 }
  0x61   : > { %s919_s23 = scalar_lea.vmem %s918_s29, 768  ;;  %p920_p5 = scmp.lt.s32.totalorder %s1184_s17, %s918_s29 }
  0x62   : > { %p915_p2 = pnand %p914_p9, %p1247_p10  ;;  %p921_p0 = scmp.lt.s32.totalorder %s919_s23, %s913_s6 }
  0x63   : > { %257 = vrot.lane.b32.xlu0 %v848_v2, %s991_s20 }
  0x64   : > { %263 = vrot.lane.b32.xlu1 %v851_v4, %s991_s20  ;;  %p916_p4 = pneg %p915_p2  ;;  %p922_p6 = por %p921_p0, %p920_p5 }
  0x66   : > { %p923_p13 = pnand %p922_p6, %p916_p4 }
  0x67   : > { %297 = vrot.lane.b32.xlu0 %v846_v1, %s992_s28 }
  0x68   : > { %299 = vrot.lane.b32.xlu1 %v849_v3, %s992_s28 }
  0x6b   : > { %295 = vrot.lane.b32.xlu0 %v848_v2, %s992_s28 }
  0x6c   : > { %301 = vrot.lane.b32.xlu1 %v851_v4, %s992_s28 }
  0x6f   : > { %335 = vrot.lane.b32.xlu0 %v846_v1, %s993_s30 }
  0x70   : > { %337 = vrot.lane.b32.xlu1 %v849_v3, %s993_s30 }
  0x73   : > { %333 = vrot.lane.b32.xlu0 %v848_v2, %s993_s30 }
  0x74   : > { %339 = vrot.lane.b32.xlu1 %v851_v4, %s993_s30 }
  0x77   : > { %373 = vrot.lane.b32.xlu0 %v846_v1, %s994_s5 }
  0x78   : > { %375 = vrot.lane.b32.xlu1 %v849_v3, %s994_s5 }
  0x7b   : > { %371 = vrot.lane.b32.xlu0 %v848_v2, %s994_s5 }
  0x7c   : > { %377 = vrot.lane.b32.xlu1 %v851_v4, %s994_s5 }
  0x7f   : > { %411 = vrot.lane.b32.xlu0 %v846_v1, %s995_s26 }
  0x80   : > { %413 = vrot.lane.b32.xlu1 %v849_v3, %s995_s26 }
  0x83   : > { %409 = vrot.lane.b32.xlu0 %v848_v2, %s995_s26 }
  0x84   : > { %415 = vrot.lane.b32.xlu1 %v851_v4, %s995_s26 }
  0x87   : > { %449 = vrot.lane.b32.xlu0 %v846_v1, %s996_s7 }
  0x88   : > { %451 = vrot.lane.b32.xlu1 %v849_v3, %s996_s7 }
  0x8b   : > { %447 = vrot.lane.b32.xlu0 %v848_v2, %s996_s7 }
  0x8c   : > { %453 = vrot.lane.b32.xlu1 %v851_v4, %s996_s7 }
  0x8f   : > { %487 = vrot.lane.b32.xlu0 %v846_v1, %s997_s8 }
  0x90   : > { %489 = vrot.lane.b32.xlu1 %v849_v3, %s997_s8 }
  0x93   : > { %485 = vrot.lane.b32.xlu0 %v848_v2, %s997_s8 }
  0x94   : > { %491 = vrot.lane.b32.xlu1 %v851_v4, %s997_s8 }
  0xc9   : > { %v222_v8 = vpop.permute.xlu0 %221 }
  0xca   : > { %v220_v9 = vpop.permute.xlu1 %219 }
  0xcb   : > { %v228_v14 = vsel %vm227_vm1, %v220_v9, %v222_v8 }
  0xcd   : > { %v224_v10 = vpop.permute.xlu0 %223 }
  0xce   : > { %v226_v11 = vpop.permute.xlu1 %225  ;;  %v229_v12 = vsel %vm227_vm1, %v222_v8, %v224_v10 }
  0xcf   : > { %543 = vmatprep.subr.bf16.mxu0 %v229_v12  ;;  %v230_v13 = vsel %vm227_vm1, %v224_v10, %v226_v11 }
  0xd0   : > { %585 = vmatpush1.bf16.msra.mxu1 %v230_v13  ;;  %544 = vmatpush1.bf16.msra.mxu0 %v228_v14 }
  0xd1   : > { %v260_v15 = vpop.permute.xlu0 %259  ;;  %586 = vmatprep.subr.bf16.mxu1 %v989_v0 }
  0xd2   : > { %v262_v16 = vpop.permute.xlu1 %261 }
  0xd3   : > { %v267_v17 = vsel %vm265_vm2, %v260_v15, %v262_v16 }
  0xd4   : > { %545 = vmatprep.subr.bf16.mxu0 %v267_v17 }
  0xd5   : > { %v258_v18 = vpop.permute.xlu0 %257 }
  0xd6   : > { %v264_v19 = vpop.permute.xlu1 %263  ;;  %v266_v20 = vsel %vm265_vm2, %v258_v18, %v260_v15 }
  0xd7   : > { %546 = vmatpush1.bf16.msra.mxu0 %v266_v20  ;;  %v268_v21 = vsel %vm265_vm2, %v262_v16, %v264_v19 }
  0xd8   : > { %587 = vmatpush1.bf16.msra.mxu1 %v268_v21 }
  0xd9   : > { %v298_v22 = vpop.permute.xlu0 %297  ;;  %588 = vmatprep.subr.bf16.mxu1 %v989_v0 }
  0xda   : > { %v300_v23 = vpop.permute.xlu1 %299 }
  0xdb   : > { %v305_v24 = vsel %vm303_vm3, %v298_v22, %v300_v23 }
  0xdc   : > { %547 = vmatprep.subr.bf16.mxu0 %v305_v24 }
  0xdd   : > { %v296_v25 = vpop.permute.xlu0 %295 }
  0xde   : > { %v302_v26 = vpop.permute.xlu1 %301  ;;  %v304_v27 = vsel %vm303_vm3, %v296_v25, %v298_v22 }
  0xdf   : > { %548 = vmatpush1.bf16.msra.mxu0 %v304_v27  ;;  %v306_v28 = vsel %vm303_vm3, %v300_v23, %v302_v26 }
  0xe0   : > { %589 = vmatpush1.bf16.msra.mxu1 %v306_v28 }
  0xe1   : > { %v336_v29 = vpop.permute.xlu0 %335  ;;  %590 = vmatprep.subr.bf16.mxu1 %v989_v0 }
  0xe2   : > { %v338_v30 = vpop.permute.xlu1 %337 }
  0xe3   : > { %v343_v31 = vsel %vm341_vm4, %v336_v29, %v338_v30 }
  0xe4   : > { %549 = vmatprep.subr.bf16.mxu0 %v343_v31 }
  0xe5   : > { %v334_v32 = vpop.permute.xlu0 %333 }
  0xe6   : > { %v340_v33 = vpop.permute.xlu1 %339  ;;  %v342_v34 = vsel %vm341_vm4, %v334_v32, %v336_v29 }
  0xe7   : > { %550 = vmatpush1.bf16.msra.mxu0 %v342_v34  ;;  %v344_v35 = vsel %vm341_vm4, %v338_v30, %v340_v33 }
  0xe8   : > { %591 = vmatpush1.bf16.msra.mxu1 %v344_v35 }
  0xe9   : > { %v374_v36 = vpop.permute.xlu0 %373  ;;  %592 = vmatprep.subr.bf16.mxu1 %v989_v0 }
  0xea   : > { %v376_v37 = vpop.permute.xlu1 %375 }
  0xeb   : > { %v381_v38 = vsel %vm379_vm5, %v374_v36, %v376_v37 }
  0xec   : > { %551 = vmatprep.subr.bf16.mxu0 %v381_v38 }
  0xed   : > { %v372_v39 = vpop.permute.xlu0 %371 }
  0xee   : > { %v378_v40 = vpop.permute.xlu1 %377  ;;  %v380_v41 = vsel %vm379_vm5, %v372_v39, %v374_v36 }
  0xef   : > { %552 = vmatpush1.bf16.msra.mxu0 %v380_v41  ;;  %v382_v42 = vsel %vm379_vm5, %v376_v37, %v378_v40 }
  0xf0   : > { %593 = vmatpush1.bf16.msra.mxu1 %v382_v42 }
  0xf1   : > { %v412_v43 = vpop.permute.xlu0 %411  ;;  %594 = vmatprep.subr.bf16.mxu1 %v989_v0 }
  0xf2   : > { %v414_v44 = vpop.permute.xlu1 %413 }
  0xf3   : > { %v419_v45 = vsel %vm417_vm6, %v412_v43, %v414_v44 }
  0xf4   : > { %553 = vmatprep.subr.bf16.mxu0 %v419_v45 }
  0xf5   : > { %v410_v46 = vpop.permute.xlu0 %409 }
  0xf6   : > { %v416_v47 = vpop.permute.xlu1 %415  ;;  %v418_v48 = vsel %vm417_vm6, %v410_v46, %v412_v43 }
  0xf7   : > { %554 = vmatpush1.bf16.msra.mxu0 %v418_v48  ;;  %v420_v49 = vsel %vm417_vm6, %v414_v44, %v416_v47 }
  0xf8   : > { %595 = vmatpush1.bf16.msra.mxu1 %v420_v49 }
  0xf9   : > { %v450_v50 = vpop.permute.xlu0 %449  ;;  %596 = vmatprep.subr.bf16.mxu1 %v989_v0 }
  0xfa   : > { %v452_v51 = vpop.permute.xlu1 %451 }
  0xfb   : > { %v457_v52 = vsel %vm455_vm7, %v450_v50, %v452_v51 }
  0xfc   : > { %555 = vmatprep.subr.bf16.mxu0 %v457_v52 }
  0xfd   : > { %v448_v53 = vpop.permute.xlu0 %447 }
  0xfe   : > { %v454_v54 = vpop.permute.xlu1 %453  ;;  %v456_v55 = vsel %vm455_vm7, %v448_v53, %v450_v50 }
  0xff   : > { %556 = vmatpush1.bf16.msra.mxu0 %v456_v55  ;;  %v458_v56 = vsel %vm455_vm7, %v452_v51, %v454_v54 }
 0x100   : > { %597 = vmatpush1.bf16.msra.mxu1 %v458_v56 }
 0x101   : > { %v488_v57 = vpop.permute.xlu0 %487  ;;  %598 = vmatprep.subr.bf16.mxu1 %v989_v0 }
 0x102   : > { %v490_v58 = vpop.permute.xlu1 %489 }
 0x103   : > { %v495_v59 = vsel %vm493_vm8, %v488_v57, %v490_v58 }
 0x104   : > { %557 = vmatprep.subr.bf16.mxu0 %v495_v59 }
 0x105   : > { %v486_v60 = vpop.permute.xlu0 %485 }
 0x106   : > { %v492_v61 = vpop.permute.xlu1 %491  ;;  %v494_v62 = vsel %vm493_vm8, %v486_v60, %v488_v57 }
 0x107   : > { %558 = vmatpush1.bf16.msra.mxu0 %v494_v62  ;;  %v496_v1 = vsel %vm493_vm8, %v490_v58, %v492_v61 }
 0x108   : > { %599 = vmatpush1.bf16.msra.mxu1 %v496_v1 }
 0x10a   : > { %574 = vmatmul.mubr.bf16.vlgmr.msra.gmra.mrb[0].mxu0 %v768_v63 }
 0x10b   : > { %615 = vmatmul.mubr.bf16.vlgmr.msra.gmra.mrb[0].mxu1 %v768_v63 }
 0x1dd   : > { %v575_v2 = vpop.f32.mrb[0].mxu0 }
 0x1de   : > { %v622_v0 = vmax.f32 %v575_v2, 0.0  ;;  %v616_v3 = vpop.f32.mrb[0].mxu1  ;;  %v577_v4 = vpop.f32.mrb[1].mxu0 }
 0x1df   : > { %v624_v5 = vmax.f32 %v616_v3, 0.0  ;;  %v623_v7 = vmax.f32 %v577_v4, 0.0  ;;  %v618_v8 = vpop.f32.mrb[1].mxu1  ;;  %v579_v9 = vpop.f32.mrb[2].mxu0 }
 0x1e0   : > { %625 = vst [vmem:[%s174_s16] sm:$0xff] %v622_v0  ;;  %v619_v6 = vpop.f32.mrb[2].mxu1  ;;  %v580_v10 = vpop.f32.mrb[3].mxu0 }
 0x1e1   : > { %627 = vst [vmem:[%s174_s16 + $0x10] sm:$0xff] %v624_v5  ;;  %626 = vst [vmem:[%s174_s16 + $0x8] sm:$0xff] %v623_v7  ;;  %v620_v11 = vpop.f32.mrb[3].mxu1 }
 0x1e2   : > { %926 = shalt.err (!%p923_p13)
}
 0x1e3   : > { %s927_s4 = scalar_lea.hbm %s1182_s3, 384  ;;  %s931_s30 = scalar_lea.hbm %s1228_s2, 768 }
 0x1e4   : > { %p928_p7 = scmp.ne.s32.totalorder %s1182_s3, %s927_s4  ;;  %p932_p1 = scmp.lt.u32.totalorder %s1182_s3, %s1228_s2 }
 0x1e5   : > { %p933_p8 = scmp.lt.u32.totalorder %s931_s30, %s927_s4  ;;  %p935_p9 = scmp.lt.u32.totalorder %s927_s4, %s1182_s3 }
 0x1e6   : > { %p929_p3 = pnand %p928_p7, %p1247_p10 }
 0x1e7   : > { %p934_p11 = por %p933_p8, %p932_p1 }
 0x1e8   : > { %p930_p12 = pneg %p929_p3 }
 0x1e9   : > { %p936_p2 = por %p935_p9, %p934_p11 }
 0x1eb   : > { %p937_p4 = pnand %p936_p2, %p930_p12 }
 0x1ed   : > { %940 = shalt.err (!%p937_p4)
}
 0x1ee   : > { %784 = dma.vmem_to_hbm [thread:$0]  (%p1247_p10), %s1184_s17, 384, %s1182_s3, %s629_s13  }
 0x1ef PF: > { %s655_s7 = sand.u32 1, %s971_s9   ;;  %p1248_p5 = scmp.ne.s32.totalorder %s1237_s22, 0 }
 0x1f0   : > { %p1249_p0 = scmp.ge.s32.totalorder %s983_s12, 2  ;;  %s656_s8 = scalar_lea.sflag [#allocation5], %s655_s7 }
 0x1f2   : > { %p795_p6 = pnand %p1249_p0, %p1248_p5 }
 0x1f4   : > { %966 = dma.done.wait (!%p795_p6), %s656_s8, 384  }
 0x1f5   : > { %968 = vsyncadd (!%p795_p6), %s656_s8, 4294966912  ;;  %p16_p13 = scmp.ge.s32.totalorder %s1039_s15, 4   ;;  %s1250_s9 = smov %s975_s10 }
 0x1f6   : > { %s1251_s10 = smov %s979_s11  ;;  %s1252_s11 = smov %s1051_s18 }
 0x1f7   : > { %s1253_s12 = smov %s1039_s15  ;;  %18 = sbr.rel (!%p16_p13) target bundleno = 6 (0x6), region = 77 }
 0x1fe   :  { %661 = vsyncpa [#allocation4], 1 }
 0x1ff   :  { %663 = vsyncpa [#allocation4 + $0x1], 1 }
 0x200   :  { %664 = vsyncpa [#allocation7], 1 }
 0x201   :  { %665 = vsyncpa [#allocation5], 1 }
 0x202   :  { %667 = vsyncpa [#allocation5 + $0x1], 1 }

</bundles_post_ra>
